<compile_context>
chip_gen: v7x
topology: tpu7x:2x2x1
jax: 0.10.0
libtpu: 0.0.40
codegen_flags: <defaults>
</compile_context>

<pallas_src>
import functools

import jax
import jax.numpy as jnp
from jax.experimental import pallas as pl
from jax.experimental.pallas import tpu as pltpu


def _round_up(x: int, m: int) -> int:
    return ((x + m - 1) // m) * m


def _pick_tile(n: int, unit: int, cap: int) -> int:
    """Largest tile (multiple of `unit`, <= cap) that minimizes the padded size."""
    n_unit = _round_up(n, unit)
    cap = max(unit, (min(cap, n_unit) // unit) * unit)
    best_t, best_pad = unit, _round_up(n, unit)
    for t in range(unit, cap + 1, unit):
        padded = _round_up(n, t)
        if padded < best_pad or (padded == best_pad and t > best_t):
            best_pad, best_t = padded, t
    return best_t


def smodel_kernel(x_ref, p_ref, o_ref):
    # x_ref: (2, TB, TS) stacked input channels (S on lanes, batch on sublanes)
    # p_ref: (TB, 17)    raw per-batch parameter rows
    # o_ref: (TB, TS)    lane-dense output
    x0 = x_ref[0].astype(jnp.float32)
    x1 = x_ref[1].astype(jnp.float32)
    p = p_ref[...].astype(jnp.float32)

    def col(k):
        # (TB, 1) per-batch scalar column; broadcasts across the TS lanes.
        return p[:, k:k + 1]

    # Fully unrolled VPU multiply-adds; the 2->4->1 contractions never touch the MXU.
    #   h_j = x0 * w1[0,j] + x1 * w1[1,j] + b1[j],  w1[i,j] = p[2j+i], b1[j] = p[8+j]
    #   y   = sum_j relu(h_j) * p[12+j] + p[16]
    acc = jnp.zeros_like(x0)
    for j in range(4):
        h = x0 * col(2 * j) + x1 * col(2 * j + 1) + col(8 + j)
        acc = acc + jnp.maximum(h, 0.0) * col(12 + j)
    y = acc + col(16)

    # sigmoid(y) = 1 / (1 + exp(-y)): exp lands on the EUP, reciprocal stays off the VPU.
    o_ref[...] = pl.reciprocal(1.0 + jnp.exp(-y), approx=True).astype(o_ref.dtype)


@jax.jit
def smodel_forward(x, params):
    """x: (B, S, 2); params: (B, 17) -> (B, S, 1). Matches SModel(batch_first=True)."""
    B, S, d_in = x.shape
    assert d_in == 2 and params.shape == (B, 17)
    dtype = x.dtype
    itemsize = jnp.dtype(dtype).itemsize

    # --- tile selection (static, shape-only Python) ----------------------------------
    sub = max(8, 32 // max(itemsize, 1))            # sublane unit: 8 f32 / 16 bf16 / 32 i8
    tb = _pick_tile(B, sub, 128)                    # batches on sublanes
    # ~2 MiB (f32) per (tb, ts) slab: ~85%+ of HBM roofline per the tile-size curve while
    # 2 x (input + output) blocks stay far below the scoped-VMEM limit on v5e/v6e/v7x.
    ts_cap = max(128, min(8192, (512 * 1024 // tb) // 128 * 128))
    ts = _pick_tile(S, 128, ts_cap)                 # sequence on lanes
    B_pad, S_pad = _round_up(B, tb), _round_up(S, ts)

    # Keep >= 2 grid steps when the problem can be split: v7x shards "parallel" grid axes
    # across its 2 TensorCores, and a (1, 1) grid would idle one of them.
    if (B_pad // tb) * (S_pad // ts) == 1:
        if S_pad >= 256:
            ts = _pick_tile(S, 128, S_pad // 2)
            S_pad = _round_up(S, ts)
        elif B_pad >= 2 * sub:
            tb = _pick_tile(B, sub, B_pad // 2)
            B_pad = _round_up(B, tb)

    # --- lane-dense re-layout: one stacked operand, single fused pass ----------------
    xs = jnp.moveaxis(x, 2, 0)                      # (2, B, S), channels outermost
    if (B_pad, S_pad) != (B, S):
        xs = jnp.pad(xs, ((0, 0), (0, B_pad - B), (0, S_pad - S)))
        params = jnp.pad(params, ((0, B_pad - B), (0, 0)))

    # j (sequence) is the fastest-varying grid axis: the params block index (i, 0) is
    # constant across consecutive steps, so its (tb, 17) block is not re-DMA'd.
    grid = (B_pad // tb, S_pad // ts)

    cost = pl.CostEstimate(
        flops=30 * B_pad * S_pad,
        transcendentals=B_pad * S_pad,
        bytes_accessed=3 * B_pad * S_pad * itemsize + B_pad * 17 * params.dtype.itemsize,
    )

    out = pl.pallas_call(
        smodel_kernel,
        out_shape=jax.ShapeDtypeStruct((B_pad, S_pad), dtype),
        grid_spec=pl.GridSpec(
            grid=grid,
            in_specs=[
                pl.BlockSpec((2, tb, ts), lambda i, j: (0, i, j)),   # stacked channels
                pl.BlockSpec((tb, 17), lambda i, j: (i, 0)),         # raw per-batch params
            ],
            out_specs=pl.BlockSpec((tb, ts), lambda i, j: (i, j)),
        ),
        compiler_params=pltpu.CompilerParams(
            dimension_semantics=("parallel", "parallel"),
            vmem_limit_bytes=32 * 1024 * 1024,
            allow_input_fusion=[True, False],
        ),
        cost_estimate=cost,
    )(xs, params)

    if (B_pad, S_pad) == (B, S):
        return out[:, :, None]                      # free reshape, no trim pass
    return out[:B, :S, None]                        # trim only when padding exists


def smodel_reference(x, params):
    """Pure-JAX reference mirroring the PyTorch batch_first=True forward."""
    B, S, _ = x.shape
    w1 = params[:, :8].reshape(B, 4, 2).transpose(0, 2, 1)
    b1 = params[:, 8:12].reshape(B, 1, 4)
    w2 = params[:, 12:16].reshape(B, 1, 4).transpose(0, 2, 1)
    b2 = params[:, 16:17].reshape(B, 1, 1)
    h = jnp.maximum(jnp.einsum("bsd,bdh->bsh", x, w1) + b1, 0.0)
    y = jnp.einsum("bsh,bho->bso", h, w2) + b2
    return jax.nn.sigmoid(y)


if __name__ == "__main__":
    key = jax.random.PRNGKey(0)
    kx, kw, kx2, kw2 = jax.random.split(key, 4)

    # Small shapes consistent with the module's forward.
    B, S = 2, 8
    x = jax.random.normal(kx, (B, S, 2), dtype=jnp.float32)
    params = jax.random.normal(kw, (B, 17), dtype=jnp.float32)

    out = jax.block_until_ready(smodel_forward(x, params))
    ref = smodel_reference(x, params)
    assert out.shape == (B, S, 1)
    # Tolerance covers the EUP approximate reciprocal in the sigmoid (output range (0,1)).
    assert jnp.allclose(out, ref, atol=5e-3), "mismatch vs reference (small)"

    # Larger case: exercises padding, the megacore grid split, and a multi-step grid.
    B2, S2 = 20, 1200
    x2 = jax.random.normal(kx2, (B2, S2, 2), dtype=jnp.float32)
    params2 = jax.random.normal(kw2, (B2, 17), dtype=jnp.float32)
    out2 = jax.block_until_ready(smodel_forward(x2, params2))
    ref2 = smodel_reference(x2, params2)
    assert out2.shape == (B2, S2, 1)
    assert jnp.allclose(out2, ref2, atol=5e-3), "mismatch vs reference (tiled)"

    print("KERNEL_OK")
</pallas_src>

<mosaic_0001>
module attributes {stable_mosaic.version = 11 : i64} {
  func.func @smodel_kernel(%arg0: i32, %arg1: i32, %arg2: memref<2x8x128xf32, #tpu.memory_space<vmem>>, %arg3: memref<8x17xf32, #tpu.memory_space<vmem>>, %arg4: memref<8x128xf32, #tpu.memory_space<vmem>>) attributes {dimension_semantics = [#tpu.dimension_semantics<parallel>, #tpu.dimension_semantics<parallel>], iteration_bounds = array<i64: 1, 1>, scalar_prefetch = 0 : i64, scratch_operands = 0 : i64, tpu.core_type = #tpu.core_type<tc>, window_params = [{transform_indices = @transform_0, window_bounds = array<i64: 2, 8, 128>}, {transform_indices = @transform_1, window_bounds = array<i64: 8, 17>}, {transform_indices = @transform_2, window_bounds = array<i64: 8, 128>}]} {
    %c0 = arith.constant 0 : index
    %c0_0 = arith.constant 0 : index
    %c0_1 = arith.constant 0 : index
    %0 = vector.load %arg2[%c0, %c0_0, %c0_1] : memref<2x8x128xf32, #tpu.memory_space<vmem>>, vector<1x8x128xf32>
    %1 = vector.shape_cast %0 : vector<1x8x128xf32> to vector<8x128xf32>
    %c1 = arith.constant 1 : index
    %c0_2 = arith.constant 0 : index
    %c0_3 = arith.constant 0 : index
    %2 = vector.load %arg2[%c1, %c0_2, %c0_3] : memref<2x8x128xf32, #tpu.memory_space<vmem>>, vector<1x8x128xf32>
    %3 = vector.shape_cast %2 : vector<1x8x128xf32> to vector<8x128xf32>
    %c0_4 = arith.constant 0 : index
    %c0_5 = arith.constant 0 : index
    %4 = vector.load %arg3[%c0_4, %c0_5] : memref<8x17xf32, #tpu.memory_space<vmem>>, vector<8x17xf32>
    %cst = arith.constant 0.000000e+00 : f32
    %5 = vector.broadcast %cst : f32 to vector<8x128xf32>
    %6 = vector.extract_strided_slice %4 {offsets = [0, 0], sizes = [8, 1], strides = [1, 1]} : vector<8x17xf32> to vector<8x1xf32>
    %7 = vector.broadcast %6 : vector<8x1xf32> to vector<8x128xf32>
    %8 = arith.mulf %1, %7 : vector<8x128xf32>
    %9 = vector.extract_strided_slice %4 {offsets = [0, 1], sizes = [8, 1], strides = [1, 1]} : vector<8x17xf32> to vector<8x1xf32>
    %10 = vector.broadcast %9 : vector<8x1xf32> to vector<8x128xf32>
    %11 = arith.mulf %3, %10 : vector<8x128xf32>
    %12 = arith.addf %8, %11 : vector<8x128xf32>
    %13 = vector.extract_strided_slice %4 {offsets = [0, 8], sizes = [8, 1], strides = [1, 1]} : vector<8x17xf32> to vector<8x1xf32>
    %14 = vector.broadcast %13 : vector<8x1xf32> to vector<8x128xf32>
    %15 = arith.addf %12, %14 : vector<8x128xf32>
    %cst_6 = arith.constant 0.000000e+00 : f32
    %16 = vector.broadcast %cst_6 : f32 to vector<8x128xf32>
    %17 = arith.maximumf %15, %16 : vector<8x128xf32>
    %18 = vector.extract_strided_slice %4 {offsets = [0, 12], sizes = [8, 1], strides = [1, 1]} : vector<8x17xf32> to vector<8x1xf32>
    %19 = vector.broadcast %18 : vector<8x1xf32> to vector<8x128xf32>
    %20 = arith.mulf %17, %19 : vector<8x128xf32>
    %21 = arith.addf %5, %20 : vector<8x128xf32>
    %22 = vector.extract_strided_slice %4 {offsets = [0, 2], sizes = [8, 1], strides = [1, 1]} : vector<8x17xf32> to vector<8x1xf32>
    %23 = vector.broadcast %22 : vector<8x1xf32> to vector<8x128xf32>
    %24 = arith.mulf %1, %23 : vector<8x128xf32>
    %25 = vector.extract_strided_slice %4 {offsets = [0, 3], sizes = [8, 1], strides = [1, 1]} : vector<8x17xf32> to vector<8x1xf32>
    %26 = vector.broadcast %25 : vector<8x1xf32> to vector<8x128xf32>
    %27 = arith.mulf %3, %26 : vector<8x128xf32>
    %28 = arith.addf %24, %27 : vector<8x128xf32>
    %29 = vector.extract_strided_slice %4 {offsets = [0, 9], sizes = [8, 1], strides = [1, 1]} : vector<8x17xf32> to vector<8x1xf32>
    %30 = vector.broadcast %29 : vector<8x1xf32> to vector<8x128xf32>
    %31 = arith.addf %28, %30 : vector<8x128xf32>
    %cst_7 = arith.constant 0.000000e+00 : f32
    %32 = vector.broadcast %cst_7 : f32 to vector<8x128xf32>
    %33 = arith.maximumf %31, %32 : vector<8x128xf32>
    %34 = vector.extract_strided_slice %4 {offsets = [0, 13], sizes = [8, 1], strides = [1, 1]} : vector<8x17xf32> to vector<8x1xf32>
    %35 = vector.broadcast %34 : vector<8x1xf32> to vector<8x128xf32>
    %36 = arith.mulf %33, %35 : vector<8x128xf32>
    %37 = arith.addf %21, %36 : vector<8x128xf32>
    %38 = vector.extract_strided_slice %4 {offsets = [0, 4], sizes = [8, 1], strides = [1, 1]} : vector<8x17xf32> to vector<8x1xf32>
    %39 = vector.broadcast %38 : vector<8x1xf32> to vector<8x128xf32>
    %40 = arith.mulf %1, %39 : vector<8x128xf32>
    %41 = vector.extract_strided_slice %4 {offsets = [0, 5], sizes = [8, 1], strides = [1, 1]} : vector<8x17xf32> to vector<8x1xf32>
    %42 = vector.broadcast %41 : vector<8x1xf32> to vector<8x128xf32>
    %43 = arith.mulf %3, %42 : vector<8x128xf32>
    %44 = arith.addf %40, %43 : vector<8x128xf32>
    %45 = vector.extract_strided_slice %4 {offsets = [0, 10], sizes = [8, 1], strides = [1, 1]} : vector<8x17xf32> to vector<8x1xf32>
    %46 = vector.broadcast %45 : vector<8x1xf32> to vector<8x128xf32>
    %47 = arith.addf %44, %46 : vector<8x128xf32>
    %cst_8 = arith.constant 0.000000e+00 : f32
    %48 = vector.broadcast %cst_8 : f32 to vector<8x128xf32>
    %49 = arith.maximumf %47, %48 : vector<8x128xf32>
    %50 = vector.extract_strided_slice %4 {offsets = [0, 14], sizes = [8, 1], strides = [1, 1]} : vector<8x17xf32> to vector<8x1xf32>
    %51 = vector.broadcast %50 : vector<8x1xf32> to vector<8x128xf32>
    %52 = arith.mulf %49, %51 : vector<8x128xf32>
    %53 = arith.addf %37, %52 : vector<8x128xf32>
    %54 = vector.extract_strided_slice %4 {offsets = [0, 6], sizes = [8, 1], strides = [1, 1]} : vector<8x17xf32> to vector<8x1xf32>
    %55 = vector.broadcast %54 : vector<8x1xf32> to vector<8x128xf32>
    %56 = arith.mulf %1, %55 : vector<8x128xf32>
    %57 = vector.extract_strided_slice %4 {offsets = [0, 7], sizes = [8, 1], strides = [1, 1]} : vector<8x17xf32> to vector<8x1xf32>
    %58 = vector.broadcast %57 : vector<8x1xf32> to vector<8x128xf32>
    %59 = arith.mulf %3, %58 : vector<8x128xf32>
    %60 = arith.addf %56, %59 : vector<8x128xf32>
    %61 = vector.extract_strided_slice %4 {offsets = [0, 11], sizes = [8, 1], strides = [1, 1]} : vector<8x17xf32> to vector<8x1xf32>
    %62 = vector.broadcast %61 : vector<8x1xf32> to vector<8x128xf32>
    %63 = arith.addf %60, %62 : vector<8x128xf32>
    %cst_9 = arith.constant 0.000000e+00 : f32
    %64 = vector.broadcast %cst_9 : f32 to vector<8x128xf32>
    %65 = arith.maximumf %63, %64 : vector<8x128xf32>
    %66 = vector.extract_strided_slice %4 {offsets = [0, 15], sizes = [8, 1], strides = [1, 1]} : vector<8x17xf32> to vector<8x1xf32>
    %67 = vector.broadcast %66 : vector<8x1xf32> to vector<8x128xf32>
    %68 = arith.mulf %65, %67 : vector<8x128xf32>
    %69 = arith.addf %53, %68 : vector<8x128xf32>
    %70 = vector.extract_strided_slice %4 {offsets = [0, 16], sizes = [8, 1], strides = [1, 1]} : vector<8x17xf32> to vector<8x1xf32>
    %71 = vector.broadcast %70 : vector<8x1xf32> to vector<8x128xf32>
    %72 = arith.addf %69, %71 : vector<8x128xf32>
    %cst_10 = arith.constant 0.000000e+00 : f32
    %73 = vector.broadcast %cst_10 : f32 to vector<8x128xf32>
    %74 = arith.subf %73, %72 : vector<8x128xf32>
    %75 = math.exp %74 : vector<8x128xf32>
    %cst_11 = arith.constant 1.000000e+00 : f32
    %76 = vector.broadcast %cst_11 : f32 to vector<8x128xf32>
    %77 = arith.addf %76, %75 : vector<8x128xf32>
    %78 = tpu.reciprocal %77 {approx = true} : vector<8x128xf32> -> vector<8x128xf32>
    %c0_12 = arith.constant 0 : index
    %c0_13 = arith.constant 0 : index
    %79 = vector.load %arg4[%c0_12, %c0_13] : memref<8x128xf32, #tpu.memory_space<vmem>>, vector<8x128xf32>
    tpu.vector_store %arg4[%c0_12, %c0_13], %78 {strides = array<i32>} : memref<8x128xf32, #tpu.memory_space<vmem>>, vector<8x128xf32>,
    return
  }
  func.func @transform_0(%arg0: i32, %arg1: i32) -> (i32, i32, i32) {
    %c0_i32 = arith.constant 0 : i32
    %c0_i32_0 = arith.constant 0 : i32
    return %c0_i32, %arg0, %arg1 : i32, i32, i32
  }
  func.func @transform_1(%arg0: i32, %arg1: i32) -> (i32, i32) {
    %c0_i32 = arith.constant 0 : i32
    %c0_i32_0 = arith.constant 0 : i32
    return %arg0, %c0_i32 : i32, i32
  }
  func.func @transform_2(%arg0: i32, %arg1: i32) -> (i32, i32) {
    %c0_i32 = arith.constant 0 : i32
    return %arg0, %arg1 : i32, i32
  }
}

</mosaic_0001>

<bundles_post_ra>
// kernel: smodel_forward.2
= control target key start
LH: loop header
LB: loop body
LE: loop exit
PB: predicated region body
PF: predicated region fallthrough
CT: control target
= control target key end

     0   :  { %v193_v2 = vmov 2   ;;  %v194_v3 = vmov 0   ;;  %v195_v4 = vmov 3   ;;  %v196_v5 = vmov 1   ;;  %s251_s0 = inlined_call_operand.vmem [shape: f32[8,17], index: 0, kind: input, shape index: {}]   ;;  %s252_s1 = inlined_call_operand.vmem [shape: f32[2,2,8], index: 1, kind: input, shape index: {}]   ;;  %s253_s2 = inlined_call_operand.<no memory space> [shape: f32[], index: 2, kind: input, shape index: {}]   ;;  %s254_s3 = inlined_call_operand.vmem [shape: f32[8,128], index: 3, kind: output, shape index: {}]  }
   0x1   :  { %v233_v0 = vstv %s253_s2  ;;  %v44_v1 = vld [vmem:[%s251_s0] sm:$0xff]  ;;  %173 = vset.pattern.permute.xlu1 %v193_v2  ;;  %171 = vset.pattern.permute.xlu0 %v194_v3  ;;  %v197_v6 = vmov 4   ;;  %v198_v7 = vmov 5   ;;  %v199_v8 = vmov 8  }
   0x2   :  { %70 = vperm.xlu1 %173, %v44_v1   ;;  %47 = vperm.xlu0 %171, %v44_v1   ;;  %v200_v9 = vmov 6   ;;  %v201_v10 = vmov 9   ;;  %v202_v11 = vmov 12   ;;  %v203_v12 = vmov 7   ;;  %v13_v27 = vld [vmem:[%s252_s1] sm:$0x3] }
   0x3   :  { %v204_v13 = vmov 14   ;;  %v205_v14 = vmov 10   ;;  %v206_v15 = vmov 16   ;;  %v207_v16 = vmov 13   ;;  %v153_v28 = vld [vmem:[%s252_s1 + $0x2] sm:$0x3] }
   0x4   :  { %v208_v17 = vmov 11   ;;  %v209_v18 = vmov 15   ;;  %v14_v21 = vlaneseq }
   0x6   :  { %174 = vset.pattern.permute.xlu1 %v195_v4  ;;  %172 = vset.pattern.permute.xlu0 %v196_v5  ;;  %v15_v23 = vshrl.u32 %v14_v21, 7  ;;  %v20_v26 = vand.u32 127, %v14_v21 }
   0x7   :  { %75 = vperm.xlu1 %174, %v44_v1   ;;  %52 = vperm.xlu0 %172, %v44_v1  }
   0x8   :  { %vm17_vm0 = vcmp.lt.s32.totalorder %v15_v23, 2  ;;  %vm22_vm1 = vcmp.lt.s32.totalorder %v20_v26, 8 }
   0x9   :  { %v18_v29 = vsel %vm17_vm0, %v13_v27, %v233_v0  ;;  %v32_v30 = vsel %vm17_vm0, %v153_v28, %v233_v0 }
   0xa   :  { %v23_v33 = vsel %vm22_vm1, %v18_v29, %v233_v0  ;;  %v37_v34 = vsel %vm22_vm1, %v32_v30, %v233_v0 }
   0xb   :  { %175 = vset.pattern.permute.xlu1 %v197_v6  ;;  %176 = vset.pattern.permute.xlu0 %v198_v7 }
   0xc   :  { %93 = vperm.xlu1 %175, %v44_v1   ;;  %98 = vperm.xlu0 %176, %v44_v1  }
  0x10   :  { %177 = vset.pattern.permute.xlu1 %v199_v8  ;;  %179 = vset.pattern.permute.xlu0 %v200_v9 }
  0x11   :  { %58 = vperm.xlu1 %177, %v44_v1   ;;  %116 = vperm.xlu0 %179, %v44_v1  }
  0x15   :  { %178 = vset.pattern.permute.xlu1 %v201_v10  ;;  %182 = vset.pattern.permute.xlu0 %v202_v11 }
  0x16   :  { %81 = vperm.xlu1 %178, %v44_v1   ;;  %64 = vperm.xlu0 %182, %v44_v1  }
  0x1a   :  { %180 = vset.pattern.permute.xlu1 %v203_v12  ;;  %185 = vset.pattern.permute.xlu0 %v204_v13 }
  0x1b   :  { %121 = vperm.xlu1 %180, %v44_v1   ;;  %110 = vperm.xlu0 %185, %v44_v1  }
  0x1f   :  { %181 = vset.pattern.permute.xlu1 %v205_v14  ;;  %188 = vset.pattern.permute.xlu0 %v206_v15 }
  0x20   :  { %104 = vperm.xlu1 %181, %v44_v1  }
  0x24   :  { %183 = vset.pattern.permute.xlu1 %v207_v16 }
  0x25   :  { %87 = vperm.xlu1 %183, %v44_v1  }
  0x29   :  { %184 = vset.pattern.permute.xlu1 %v208_v17 }
  0x2a   :  { %127 = vperm.xlu1 %184, %v44_v1  }
  0x2e   :  { %186 = vset.pattern.permute.xlu1 %v209_v18 }
  0x2f   :  { %133 = vperm.xlu1 %186, %v44_v1  }
  0x33   :  { %187 = vset.pattern.permute.xlu1 %v206_v15 }
  0x34   :  { %139 = vperm.xlu1 %187, %v44_v1  }
  0x81   :  { %v71_v19 = vpop.permute.xlu1 %70  ;;  %v48_v24 = vpop.permute.xlu0 %47 }
  0x82   :  { %v50_v35 = vmul.f32 %v48_v24, %v23_v33  ;;  %v73_v40 = vmul.f32 %v71_v19, %v23_v33 }
  0x86   :  { %v76_v20 = vpop.permute.xlu1 %75  ;;  %v53_v32 = vpop.permute.xlu0 %52 }
  0x87   :  { %v55_v36 = vmul.f32 %v53_v32, %v37_v34  ;;  %v78_v38 = vmul.f32 %v76_v20, %v37_v34 }
  0x89   :  { %v56_v41 = vadd.f32 %v55_v36, %v50_v35  ;;  %v79_v44 = vadd.f32 %v78_v38, %v73_v40 }
  0x8b   :  { %v94_v22 = vpop.permute.xlu1 %93  ;;  %v99_v39 = vpop.permute.xlu0 %98 }
  0x8c   :  { %v96_v42 = vmul.f32 %v94_v22, %v23_v33  ;;  %v101_v43 = vmul.f32 %v99_v39, %v37_v34 }
  0x8e   :  { %v102_v49 = vadd.f32 %v101_v43, %v96_v42 }
  0x90   :  { %v59_v25 = vpop.permute.xlu1 %58  ;;  %v117_v46 = vpop.permute.xlu0 %116 }
  0x91   :  { %v61_v47 = vadd.f32 %v59_v25, %v56_v41  ;;  %v119_v50 = vmul.f32 %v117_v46, %v23_v33 }
  0x93   :  { %v62_v53 = vmax.f32 %v61_v47, 0.0 }
  0x95   :  { %v82_v31 = vpop.permute.xlu1 %81  ;;  %v65_v56 = vpop.permute.xlu0 %64 }
  0x96   :  { %v84_v48 = vadd.f32 %v82_v31, %v79_v44  ;;  %v67_v59 = vmul.f32 %v65_v56, %v62_v53 }
  0x98   :  { %v85_v54 = vmax.f32 %v84_v48, 0.0 }
  0x9a   :  { %v122_v37 = vpop.permute.xlu1 %121  ;;  %v111_v62 = vpop.permute.xlu0 %110 }
  0x9b   :  { %v124_v51 = vmul.f32 %v122_v37, %v37_v34 }
  0x9d   :  { %v125_v58 = vadd.f32 %v124_v51, %v119_v50 }
  0x9f   :  { %v105_v45 = vpop.permute.xlu1 %104 }
  0xa0   :  { %v107_v55 = vadd.f32 %v105_v45, %v102_v49 }
  0xa2   :  { %v108_v60 = vmax.f32 %v107_v55, 0.0 }
  0xa4   :  { %v88_v52 = vpop.permute.xlu1 %87  ;;  %v113_v2 = vmul.f32 %v111_v62, %v108_v60 }
  0xa5   :  { %v90_v57 = vmul.f32 %v88_v52, %v85_v54 }
  0xa7   :  { %v91_v0 = vadd.f32 %v90_v57, %v67_v59 }
  0xa9   :  { %v128_v61 = vpop.permute.xlu1 %127  ;;  %v114_v5 = vadd.f32 %v113_v2, %v91_v0 }
  0xaa   :  { %v130_v63 = vadd.f32 %v128_v61, %v125_v58 }
  0xac   :  { %v131_v1 = vmax.f32 %v130_v63, 0.0 }
  0xae   :  { %v134_v3 = vpop.permute.xlu1 %133 }
  0xaf   :  { %v136_v4 = vmul.f32 %v134_v3, %v131_v1 }
  0xb1   :  { %v137_v6 = vadd.f32 %v136_v4, %v114_v5 }
  0xb3   :  { %v140_v7 = vpop.permute.xlu1 %139 }
  0xb4   :  { %v142_v8 = vadd.f32 %v140_v7, %v137_v6 }
  0xb6   :  { %v143_v9 = vsub.f32 0.0, %v142_v8 }
  0xb8   :  { %v144_v10 = vmul.f32 1.442695, %v143_v9 }
  0xba   :  { %189 = vpow2.f32 %v144_v10 }
  0xc4   :  { %v190_v11 = vpop.eup %189 }
  0xc5   :  { %v146_v12 = vadd.f32 1.0, %v190_v11 }
  0xc7   :  { %191 = vrcp.f32 %v146_v12 }
  0xd1   :  { %v192_v13 = vpop.eup %191 }
  0xd2   :  { %148 = vst [vmem:[%s254_s3] sm:$0xff] %v192_v13 }

</bundles_post_ra>
